<compile_context>
chip_gen: v6e
topology: v6e:2x2x1
jax: 0.10.0
libtpu: 0.0.40
codegen_flags: <defaults>
</compile_context>

<pallas_src>
import functools

import jax
import jax.numpy as jnp
from jax.experimental import pallas as pl
from jax.experimental.pallas import tpu as pltpu


_LANE = 128
_SUBLANE = 8
_MAX_BLOCK_B = 32768        # cap even when VMEM would allow more
_SPLIT_THRESHOLD = 4096     # split a single large tile in two for v7x's 2 TCs


def _round_up(x, m):
    return ((x + m - 1) // m) * m


def _vmem_budget_bytes():
    """~3/4 of physical VMEM (48 MiB on v7x, 96 MiB on v5e/v6e); conservative fallback."""
    try:
        cap = pltpu.get_tpu_info().vmem_capacity_bytes
    except Exception:
        cap = 64 * 1024 * 1024  # assume the smallest generation (v7x)
    return int(min((cap * 3) // 4, 96 * 1024 * 1024))


def _pick_block_b(D, x_itemsize, vmem_budget):
    """Largest batch tile whose double-buffered, lane-padded tiles fit the budget."""
    # Per-row bytes of the batch-tiled buffers (theta (tb,1) f32, x (tb,D) input
    # dtype, out (tb,3) f32), each lane-padded to 128 and double-buffered.
    per_row = (_round_up(1, _LANE) * 4
               + _round_up(D, _LANE) * x_itemsize
               + _round_up(3, _LANE) * 4) * 2
    tb = max(_SUBLANE, (vmem_budget // per_row) // _SUBLANE * _SUBLANE)
    return int(min(tb, _MAX_BLOCK_B))


def irt2pl_kernel(theta_ref, x_ref, w0_ref, b0_ref, w1_ref, b1_ref, out_ref):
    """One batch tile of TB rows.

    theta_ref : (TB, 1)   f32        gathered theta for this tile
    x_ref     : (TB, D)   in dtype   item features (cast to f32 in-kernel)
    w0_ref    : (D, 2H)   f32        [W0_difficulty | W0_discriminator]  (resident)
    b0_ref    : (1, 2H)   f32        [b0_difficulty | b0_discriminator]  (resident)
    w1_ref    : (2H, 2)   f32        block-diagonal [[w1d, 0], [0, w1a]] (resident)
    b1_ref    : (1, 2)    f32        [b1_difficulty, b1_discriminator]   (resident)
    out_ref   : (TB, 3)   f32        [logits | difficulty | discriminator]
    """
    x = x_ref[...].astype(jnp.float32)

    # Both first-layer Linears in a single MXU matmul (lane width 2H instead of H).
    h = jnp.tanh(
        jnp.dot(x, w0_ref[...], preferred_element_type=jnp.float32) + b0_ref[...]
    )

    # Second layer as one MXU matmul against a block-diagonal (2H, 2) weight:
    # column 0 = difficulty, column 1 = discriminator.  (MXU is otherwise idle;
    # avoids H-slices and cross-lane reductions.)
    dd = jnp.dot(h, w1_ref[...], preferred_element_type=jnp.float32) + b1_ref[...]
    difficulty = dd[:, 0:1]
    discriminator = dd[:, 1:2]
    logits = discriminator * (theta_ref[...] - difficulty)

    # Single full-tile packed store (one unmasked vst instead of three masked ones).
    out_ref[...] = jnp.concatenate([logits, dd], axis=-1)


def irt2pl_forward(tester_id, item_repr, params, *, block_b=None):
    B, D = item_repr.shape
    H = params["w0d"].shape[1]
    assert params["w0a"].shape[1] == H, "difficulty/discriminator hidden widths differ"

    vmem_budget = _vmem_budget_bytes()
    if block_b is None:
        block_b = _pick_block_b(D, jnp.dtype(item_repr.dtype).itemsize, vmem_budget)

    # nn.Embedding lookup: O(B) XLA gather straight from HBM -- no (B, T) one-hot,
    # no theta table resident in VMEM.
    # TODO(synk): jnp.take clamps out-of-range tester_id; PyTorch nn.Embedding raises.
    theta = jnp.take(params["theta_table"], tester_id.astype(jnp.int32), axis=0)
    theta = theta.astype(jnp.float32)                                    # (B, 1)

    # Fuse the two first-layer Linears along the output (lane) axis.
    w0 = jnp.concatenate([params["w0d"], params["w0a"]], axis=1).astype(jnp.float32)   # (D, 2H)
    b0 = jnp.concatenate([params["b0d"], params["b0a"]], axis=1).astype(jnp.float32)   # (1, 2H)
    # Block-diagonal second-layer weight for a single (2H, 2) MXU pass.
    zH = jnp.zeros((H, 1), jnp.float32)
    w1 = jnp.concatenate(
        [jnp.concatenate([params["w1d"].reshape(H, 1).astype(jnp.float32), zH], axis=1),
         jnp.concatenate([zH, params["w1a"].reshape(H, 1).astype(jnp.float32)], axis=1)],
        axis=0)                                                                        # (2H, 2)
    b1 = jnp.concatenate([params["b1d"].reshape(1, 1),
                          params["b1a"].reshape(1, 1)], axis=1).astype(jnp.float32)    # (1, 2)

    # Batch tile: full array if it fits, else block_b rows (multiple of 8, so
    # multi-tile blocks satisfy the (8, 128) rule).  When a single tile would hold
    # a *large* batch, split it in two so the parallel axis uses both TCs on v7x.
    tb = B if B <= block_b else block_b
    if tb >= B and B >= _SPLIT_THRESHOLD:
        tb = _round_up(-(-B // 2), _SUBLANE)
    grid = (pl.cdiv(B, tb),)

    out = pl.pallas_call(
        irt2pl_kernel,
        out_shape=jax.ShapeDtypeStruct((B, 3), jnp.float32),
        grid=grid,
        in_specs=[
            pl.BlockSpec((tb, 1), lambda i: (i, 0)),        # theta      (batch-tiled)
            pl.BlockSpec((tb, D), lambda i: (i, 0)),        # item_repr  (batch-tiled, input dtype)
            pl.BlockSpec((D, 2 * H), lambda i: (0, 0)),     # fused W0   (VMEM-resident)
            pl.BlockSpec((1, 2 * H), lambda i: (0, 0)),     # fused b0   (VMEM-resident)
            pl.BlockSpec((2 * H, 2), lambda i: (0, 0)),     # block-diag W1 (resident)
            pl.BlockSpec((1, 2), lambda i: (0, 0)),         # b1         (resident)
        ],
        out_specs=pl.BlockSpec((tb, 3), lambda i: (i, 0)),
        compiler_params=pltpu.CompilerParams(
            dimension_semantics=("parallel",),   # batch tiles shard across TCs on v7x
            vmem_limit_bytes=vmem_budget,        # generation-aware scoped limit
        ),
    )(theta, item_repr, w0, b0, w1, b1)

    # Module contract: dict of three (B, 1) arrays.  (Consumers that can take the
    # packed (B, 3) slab directly should use `out` and skip these slices.)
    return {
        "logits": out[:, 0:1],
        "difficulty": out[:, 1:2],
        "discriminator": out[:, 2:3],
    }


def init_params(key, item_ftr_dim, num_testers):
    """Deterministic synthetic init matching the nn.Module parameter shapes."""
    H = item_ftr_dim // 2
    ks = jax.random.split(key, 9)

    def lin(kw, kb, fan_in, fan_out):
        # stored as (in, out) so the math is x @ W + b
        w = jax.random.normal(kw, (fan_in, fan_out), jnp.float32) * 0.1
        b = jax.random.normal(kb, (1, fan_out), jnp.float32) * 0.1
        return w, b

    theta_table = jax.random.normal(ks[0], (num_testers, 1), jnp.float32)
    w0d, b0d = lin(ks[1], ks[2], item_ftr_dim, H)
    w1d, b1d = lin(ks[3], ks[4], H, 1)
    w0a, b0a = lin(ks[5], ks[6], item_ftr_dim, H)
    w1a, b1a = lin(ks[7], ks[8], H, 1)
    return {
        "theta_table": theta_table,
        "w0d": w0d, "b0d": b0d, "w1d": w1d, "b1d": b1d,
        "w0a": w0a, "b0a": b0a, "w1a": w1a, "b1a": b1a,
    }


def irt2pl_reference(tester_id, item_repr, params):
    """Pure-JAX reference mirroring the PyTorch forward."""
    theta = params["theta_table"][tester_id]                       # (B, 1)
    h_d = jnp.tanh(item_repr @ params["w0d"] + params["b0d"])
    difficulty = h_d @ params["w1d"] + params["b1d"]
    h_a = jnp.tanh(item_repr @ params["w0a"] + params["b0a"])
    discriminator = h_a @ params["w1a"] + params["b1a"]
    return {
        "logits": discriminator * (theta - difficulty),
        "difficulty": difficulty,
        "discriminator": discriminator,
    }


if __name__ == "__main__":
    B = 16               # batch of (tester, item) pairs
    item_ftr_dim = 32    # item feature dimension
    num_testers = 16

    key = jax.random.PRNGKey(0)
    k_params, k_id, k_x = jax.random.split(key, 3)

    params = init_params(k_params, item_ftr_dim, num_testers)
    tester_id = jax.random.randint(k_id, (B,), 0, num_testers, dtype=jnp.int32)
    item_repr = jax.random.normal(k_x, (B, item_ftr_dim), jnp.float32)

    # Default path: VMEM-derived tile (single tile here since B is tiny).
    out = jax.jit(irt2pl_forward)(tester_id, item_repr, params)
    jax.block_until_ready(out)

    # Multi-tile path (grid of 2) to exercise the batch pipeline / index maps.
    out_tiled = jax.jit(functools.partial(irt2pl_forward, block_b=8))(
        tester_id, item_repr, params)
    jax.block_until_ready(out_tiled)

    ref = irt2pl_reference(tester_id, item_repr, params)
    # Tolerance allows for MXU f32-pass rounding differences vs. the XLA reference.
    for name in ("logits", "difficulty", "discriminator"):
        assert jnp.allclose(out[name], ref[name], atol=2e-3, rtol=2e-3), name
        assert jnp.allclose(out_tiled[name], ref[name], atol=2e-3, rtol=2e-3), name

    print("KERNEL_OK")
</pallas_src>

<mosaic_0001>
module attributes {stable_mosaic.version = 11 : i64} {
  func.func @irt2pl_kernel(%arg0: i32, %arg1: memref<16x1xf32, #tpu.memory_space<vmem>>, %arg2: memref<16x32xf32, #tpu.memory_space<vmem>>, %arg3: memref<32x32xf32, #tpu.memory_space<vmem>>, %arg4: memref<1x32xf32, #tpu.memory_space<vmem>>, %arg5: memref<32x2xf32, #tpu.memory_space<vmem>>, %arg6: memref<1x2xf32, #tpu.memory_space<vmem>>, %arg7: memref<16x3xf32, #tpu.memory_space<vmem>>) attributes {dimension_semantics = [#tpu.dimension_semantics<parallel>], iteration_bounds = array<i64: 1>, scalar_prefetch = 0 : i64, scratch_operands = 0 : i64, tpu.core_type = #tpu.core_type<tc>, window_params = [{transform_indices = @transform_0, window_bounds = array<i64: 16, 1>}, {transform_indices = @transform_1, window_bounds = array<i64: 16, 32>}, {pipeline_mode = #tpu.pipeline_mode<synchronous>, transform_indices = @transform_2, window_bounds = array<i64: 32, 32>}, {pipeline_mode = #tpu.pipeline_mode<synchronous>, transform_indices = @transform_3, window_bounds = array<i64: 1, 32>}, {pipeline_mode = #tpu.pipeline_mode<synchronous>, transform_indices = @transform_4, window_bounds = array<i64: 32, 2>}, {pipeline_mode = #tpu.pipeline_mode<synchronous>, transform_indices = @transform_5, window_bounds = array<i64: 1, 2>}, {transform_indices = @transform_6, window_bounds = array<i64: 16, 3>}]} {
    %c0 = arith.constant 0 : index
    %c0_0 = arith.constant 0 : index
    %0 = vector.load %arg2[%c0, %c0_0] : memref<16x32xf32, #tpu.memory_space<vmem>>, vector<16x32xf32>
    %c0_1 = arith.constant 0 : index
    %c0_2 = arith.constant 0 : index
    %1 = vector.load %arg3[%c0_1, %c0_2] : memref<32x32xf32, #tpu.memory_space<vmem>>, vector<32x32xf32>
    %cst = arith.constant dense<0.000000e+00> : vector<16x32xf32>
    %2 = tpu.matmul %0, %1, %cst {dimension_numbers = #tpu.dot_dimension_numbers<[1], [0], [0], [1], [0, 0, 1, 1], [], []>} : vector<16x32xf32>, vector<32x32xf32>, vector<16x32xf32> -> vector<16x32xf32>
    %c0_3 = arith.constant 0 : index
    %c0_4 = arith.constant 0 : index
    %3 = vector.load %arg4[%c0_3, %c0_4] : memref<1x32xf32, #tpu.memory_space<vmem>>, vector<1x32xf32>
    %4 = vector.broadcast %3 : vector<1x32xf32> to vector<16x32xf32>
    %5 = arith.addf %2, %4 : vector<16x32xf32>
    %6 = math.tanh %5 : vector<16x32xf32>
    %c0_5 = arith.constant 0 : index
    %c0_6 = arith.constant 0 : index
    %7 = vector.load %arg5[%c0_5, %c0_6] : memref<32x2xf32, #tpu.memory_space<vmem>>, vector<32x2xf32>
    %cst_7 = arith.constant dense<0.000000e+00> : vector<16x2xf32>
    %8 = tpu.matmul %6, %7, %cst_7 {dimension_numbers = #tpu.dot_dimension_numbers<[1], [0], [0], [1], [0, 0, 1, 1], [], []>} : vector<16x32xf32>, vector<32x2xf32>, vector<16x2xf32> -> vector<16x2xf32>
    %c0_8 = arith.constant 0 : index
    %c0_9 = arith.constant 0 : index
    %9 = vector.load %arg6[%c0_8, %c0_9] : memref<1x2xf32, #tpu.memory_space<vmem>>, vector<1x2xf32>
    %10 = vector.broadcast %9 : vector<1x2xf32> to vector<16x2xf32>
    %11 = arith.addf %8, %10 : vector<16x2xf32>
    %12 = vector.extract_strided_slice %11 {offsets = [0, 0], sizes = [16, 1], strides = [1, 1]} : vector<16x2xf32> to vector<16x1xf32>
    %13 = vector.extract_strided_slice %11 {offsets = [0, 1], sizes = [16, 1], strides = [1, 1]} : vector<16x2xf32> to vector<16x1xf32>
    %c0_10 = arith.constant 0 : index
    %c0_11 = arith.constant 0 : index
    %14 = vector.load %arg1[%c0_10, %c0_11] : memref<16x1xf32, #tpu.memory_space<vmem>>, vector<16x1xf32>
    %15 = arith.subf %14, %12 : vector<16x1xf32>
    %16 = arith.mulf %13, %15 : vector<16x1xf32>
    %17 = tpu.concatenate %16, %11 in 1 : vector<16x1xf32>, vector<16x2xf32> -> vector<16x3xf32>
    %c0_12 = arith.constant 0 : index
    %c0_13 = arith.constant 0 : index
    %18 = vector.load %arg7[%c0_12, %c0_13] : memref<16x3xf32, #tpu.memory_space<vmem>>, vector<16x3xf32>
    tpu.vector_store %arg7[%c0_12, %c0_13], %17 {strides = array<i32>} : memref<16x3xf32, #tpu.memory_space<vmem>>, vector<16x3xf32>,
    return
  }
  func.func @transform_0(%arg0: i32) -> (i32, i32) {
    %c0_i32 = arith.constant 0 : i32
    %c0_i32_0 = arith.constant 0 : i32
    return %arg0, %c0_i32 : i32, i32
  }
  func.func @transform_1(%arg0: i32) -> (i32, i32) {
    %c0_i32 = arith.constant 0 : i32
    %c0_i32_0 = arith.constant 0 : i32
    return %arg0, %c0_i32 : i32, i32
  }
  func.func @transform_2(%arg0: i32) -> (i32, i32) {
    %c0_i32 = arith.constant 0 : i32
    %c0_i32_0 = arith.constant 0 : i32
    %c0_i32_1 = arith.constant 0 : i32
    return %c0_i32, %c0_i32_0 : i32, i32
  }
  func.func @transform_3(%arg0: i32) -> (i32, i32) {
    %c0_i32 = arith.constant 0 : i32
    %c0_i32_0 = arith.constant 0 : i32
    %c0_i32_1 = arith.constant 0 : i32
    return %c0_i32, %c0_i32_0 : i32, i32
  }
  func.func @transform_4(%arg0: i32) -> (i32, i32) {
    %c0_i32 = arith.constant 0 : i32
    %c0_i32_0 = arith.constant 0 : i32
    %c0_i32_1 = arith.constant 0 : i32
    return %c0_i32, %c0_i32_0 : i32, i32
  }
  func.func @transform_5(%arg0: i32) -> (i32, i32) {
    %c0_i32 = arith.constant 0 : i32
    %c0_i32_0 = arith.constant 0 : i32
    %c0_i32_1 = arith.constant 0 : i32
    return %c0_i32, %c0_i32_0 : i32, i32
  }
  func.func @transform_6(%arg0: i32) -> (i32, i32) {
    %c0_i32 = arith.constant 0 : i32
    %c0_i32_0 = arith.constant 0 : i32
    return %arg0, %c0_i32 : i32, i32
  }
}

</mosaic_0001>

<bundles_post_ra>
// kernel: irt2pl_forward.1
= control target key start
LH: loop header
LB: loop body
LE: loop exit
PB: predicated region body
PF: predicated region fallthrough
CT: control target
= control target key end

     0   :  { %vm36_vm0 = vcmask 261120   ;;  %s298_s21 = smov 1   ;;  %vm242_vm1 = vcmask 7168   ;;  %vm245_vm2 = vcmask 23552   ;;  %s387_s2 = inlined_call_operand.vmem [shape: f32[32,32], index: 2, kind: input, shape index: {}]   ;;  %s388_s1 = inlined_call_operand.vmem [shape: f32[16,32], index: 1, kind: input, shape index: {}]   ;;  %s389_s4 = inlined_call_operand.vmem [shape: f32[32,2], index: 4, kind: input, shape index: {}]   ;;  %s390_s3 = inlined_call_operand.vmem [shape: f32[1,32], index: 3, kind: input, shape index: {}]   ;;  %s391_s5 = inlined_call_operand.vmem [shape: f32[1,2], index: 5, kind: input, shape index: {}]   ;;  %s392_s0 = inlined_call_operand.vmem [shape: f32[16,1], index: 0, kind: input, shape index: {}]   ;;  %s393_s6 = inlined_call_operand.vmem [shape: f32[16,3], index: 6, kind: output, shape index: {}]  }
   0x1   :  { %v28_v0 = vld [vmem:[%s387_s2 + $0x18] sm:$0xff]  ;;  %v27_v1 = vld [vmem:[%s387_s2 + $0x10] sm:$0xff]  ;;  %v23_v2 = vld [vmem:[%s388_s1] sm:$0xff] }
   0x2   :  { %270 = vmatprep.subr.mxu0 %v28_v0  ;;  %v26_v3 = vld [vmem:[%s387_s2 + $0x8] sm:$0xff]  ;;  %278 = vmatprep.mubr.msk.f32.mxu0 %vm36_vm0, %v23_v2  ;;  %v25_v4 = vld [vmem:[%s387_s2] sm:$0xff]  ;;  %v123_v6 = vld [vmem:[%s389_s4 + $0x18] sm:$0xff] }
   0x3   :  { %271 = vmatpush3.msra.mxu0 %v28_v0  ;;  %v24_v5 = vld [vmem:[%s388_s1 + $0x8] sm:$0xff]  ;;  %v122_v7 = vld [vmem:[%s389_s4 + $0x10] sm:$0xff]  ;;  %281 = vmatprep.subr.mxu1 %v123_v6  ;;  %v120_v9 = vld [vmem:[%s389_s4] sm:$0xff] }
   0x4   :  { %272 = vmatprep.subr.mxu0 %v27_v1  ;;  %282 = vmatpush3.msra.mxu1 %v123_v6  ;;  %v121_v8 = vld [vmem:[%s389_s4 + $0x8] sm:$0xff]  ;;  %v252_v10 = vld [vmem:[%s390_s3] ss:$0 sm:$0xff] }
   0x5   :  { %273 = vmatpush3.msra.mxu0 %v27_v1  ;;  %283 = vmatprep.subr.mxu1 %v122_v7  ;;  %v255_v18 = vld [vmem:[%s391_s5] ss:$0 sm:$0xff]  ;;  %v213_v24 = vld [vmem:[%s392_s0 + $0x8] sm:$0xff]  ;;  %s299_s5 = smov 127  }
   0x6   :  { %274 = vmatprep.subr.mxu0 %v26_v3  ;;  %284 = vmatpush3.msra.mxu1 %v122_v7  ;;  %v212_v20 = vld [vmem:[%s392_s0] sm:$0xff] }
   0x7   :  { %275 = vmatpush3.msra.mxu0 %v26_v3  ;;  %285 = vmatprep.subr.mxu1 %v121_v8 }
   0x8   :  { %276 = vmatprep.subr.mxu0 %v25_v4  ;;  %286 = vmatpush3.msra.mxu1 %v121_v8 }
   0x9   :  { %277 = vmatpush3.msra.mxu0 %v25_v4  ;;  %287 = vmatprep.subr.mxu1 %v120_v9 }
   0xa   :  { %279 = vmatmul.mubr.msk.f32.vlgmr.msra.gmra.mxu0 %vm36_vm0, %v24_v5  ;;  %288 = vmatpush3.msra.mxu1 %v120_v9 }
  0xca   :  { %v280_v11 = vpop.f32.mrf.mxu0 }
  0xcb   :  { %v115_v12 = vadd.f32 %v280_v11, %v252_v10 }
  0xcc   :  { %v109_v13 = vpop.f32.mrf.mxu0 }
  0xcd   :  { %v110_v14 = vadd.f32 %v252_v10, %v109_v13 }
  0xcf   :  { %294 = vtanh.f32 %v110_v14 }
  0xd0   :  { %296 = vtanh.f32 %v115_v12 }
  0xdc   :  { %v295_v15 = vpop.eup %294 }
  0xdd   :  { %v297_v16 = vpop.eup %296  ;;  %289 = vmatprep.mubr.msk.f32.mxu1 %vm36_vm0, %v295_v15 }
  0xde   :  { %290 = vmatmul.mubr.msk.f32.vlgmr.msra.gmra.mxu1 %vm36_vm0, %v297_v16 }
 0x19e   :  { %v291_v17 = vpop.f32.mrf.mxu1 }
 0x19f   :  { %v209_v22 = vadd.f32 %v291_v17, %v255_v18 }
 0x1a0   :  { %v203_v19 = vpop.f32.mrf.mxu1 }
 0x1a1   :  { %v204_v21 = vadd.f32 %v255_v18, %v203_v19  ;;  %v215_v25 = vsub.f32 %v213_v24, %v209_v22 }
 0x1a3   :  { %v214_v23 = vsub.f32 %v212_v20, %v204_v21 }
 0x1a5   :  { %218 = vrot.lane.b32.xlu0 %v214_v23, %s298_s21 }
 0x1a9   :  { %220 = vrot.lane.b32.xlu0 %v215_v25, %s298_s21 }
 0x1ad   :  { %236 = vrot.lane.b32.xlu0 %v204_v21, %s298_s21 }
 0x217   :  { %v219_v26 = vpop.permute.xlu0 %218 }
 0x218   :  { %v224_v29 = vmul.f32 %v219_v26, %v204_v21 }
 0x21b   :  { %v221_v27 = vpop.permute.xlu0 %220 }
 0x21c   :  { %v225_v28 = vmul.f32 %v221_v27, %v209_v22 }
 0x21e   :  { %230 = vrot.lane.b32.xlu1 %v225_v28, %s299_s5 }
 0x21f   :  { %v237_v31 = vpop.permute.xlu0 %236 }
 0x222   :  { %228 = vrot.lane.b32.xlu1 %v224_v29, %s299_s5 }
 0x226   :  { %238 = vrot.lane.b32.xlu1 %v209_v22, %s298_s21 }
 0x290   :  { %v231_v30 = vpop.permute.xlu1 %230 }
 0x294   :  { %v229_v32 = vpop.permute.xlu1 %228 }
 0x295   :  { %v243_v33 = vsel %vm242_vm1, %v229_v32, %v237_v31 }
 0x296   :  { %246 = vst.msk [vmem:[%s393_s6] sm:$0xff] %vm245_vm2, %v243_v33 }
 0x298   :  { %v239_v34 = vpop.permute.xlu1 %238 }
 0x299   :  { %v244_v35 = vsel %vm242_vm1, %v231_v30, %v239_v34 }
 0x29a   :  { %247 = vst.msk [vmem:[%s393_s6 + $0x8] sm:$0xff] %vm245_vm2, %v244_v35 }

</bundles_post_ra>
